<compile_context>
chip_gen: v6e
topology: v6e:2x2x1
jax: 0.10.0
libtpu: 0.0.40
codegen_flags: <defaults>
</compile_context>

<pallas_src>
import functools

import jax
import jax.numpy as jnp
from jax.experimental import pallas as pl
from jax.experimental.pallas import tpu as pltpu


# ----------------------------------------------------------------------------- kernel body


def _kernel_body(x_ref, *refs, pooling, n_layers):
    """One grid step: a (Bb, N, in_dim) tile of the batch.

    refs = (w0, b0, w1, b1, ..., out_ref)
      wi : (k_i, k_{i+1})  (first layer already has the time column folded out)
      bi : (1, k_{i+1})
      out_ref : (Bb, N, out_dim)
    """
    out_ref = refs[-1]
    wb = refs[:-1]

    Bb, N, in_dim = x_ref.shape
    out_dim = out_ref.shape[-1]

    # ---- DiffeqMLP (Linear / Tanh stack; no final activation), fused over Bb*N rows ----
    h = x_ref[...].reshape(Bb * N, in_dim).astype(jnp.float32)
    for li in range(n_layers):
        w = wb[2 * li][...]
        b = wb[2 * li + 1][...]
        h = jnp.dot(h, w, preferred_element_type=jnp.float32) + b
        if li < n_layers - 1:
            h = jnp.tanh(h)
    z = h.reshape(Bb, N, out_dim)  # mask == ones, so z * mask == z

    # ---- exclusive pooling over the set dimension (axis 1 here == torch dim=-2) ----
    if pooling == "sum":
        y = jnp.sum(z, axis=1, keepdims=True) - z
    elif pooling == "mean":
        inv_denom = 1.0 / float(max(N - 1, 1))
        y = (jnp.sum(z, axis=1, keepdims=True) - z) * inv_denom
    elif pooling == "max":
        if N == 1:
            y = jnp.zeros_like(z)
        else:
            first = jnp.max(z, axis=1, keepdims=True)                    # top-1
            is_max = z == first
            masked = jnp.where(is_max, -jnp.inf, z)
            second_excl = jnp.max(masked, axis=1, keepdims=True)
            n_max = jnp.sum(is_max.astype(z.dtype), axis=1, keepdims=True)
            # torch.topk keeps duplicates: if the max appears >= 2 times, top-2 == top-1
            second = jnp.where(n_max >= 2.0, first, second_excl)
            ind = is_max.astype(z.dtype)
            y = (1.0 - ind) * first + ind * second
    else:
        raise ValueError(f"unknown pooling {pooling!r}")

    out_ref[...] = y.astype(out_ref.dtype)


# ----------------------------------------------------------------------------- wrapper


def _pick_batch_tile(B, N, target_rows=256):
    """Largest divisor of B whose tile has <= ~target_rows fused rows; keep >=2 grid steps
    when B allows so megacore / v7x 2-TC sharding has work to split."""
    best = 1
    for d in range(1, B + 1):
        if B % d == 0 and d * N <= max(target_rows, N):
            best = d
    if B // best < 2 and B >= 2:
        for d in range(best, 0, -1):
            if B % d == 0 and B // d >= 2:
                best = d
                break
    return best


def zero_trace_equivariant_encoder(
    t, x, weights, biases, *, pooling, in_dim, out_dim, batch_tile=None
):
    """Pallas implementation of ZeroTraceEquivariantEncoder.forward (mask=None path)."""
    B, N, D = x.shape
    assert D == in_dim
    n_layers = len(weights)

    # Fold the time channel into layer 0: [t, x] @ W0 + b0 == x @ W0[1:] + (t*W0[0] + b0).
    w0 = weights[0]
    b0_eff = (jnp.asarray(t, w0.dtype) * w0[0, :] + biases[0]).reshape(1, -1)
    ws = [w0[1:, :]] + list(weights[1:])
    bs = [b0_eff] + [b.reshape(1, -1) for b in biases[1:]]

    Bb = batch_tile if batch_tile is not None else _pick_batch_tile(B, N)
    assert B % Bb == 0
    grid = (B // Bb,)

    kernel = functools.partial(_kernel_body, pooling=pooling, n_layers=n_layers)

    in_specs = [pl.BlockSpec((Bb, N, in_dim), lambda i: (i, 0, 0))]
    args = [x]
    for w, b in zip(ws, bs):
        in_specs.append(pl.BlockSpec(w.shape, lambda i: (0, 0)))
        in_specs.append(pl.BlockSpec(b.shape, lambda i: (0, 0)))
        args.append(w)
        args.append(b)

    out_spec = pl.BlockSpec((Bb, N, out_dim), lambda i: (i, 0, 0))

    y = pl.pallas_call(
        kernel,
        out_shape=jax.ShapeDtypeStruct((B, N, out_dim), x.dtype),
        grid_spec=pltpu.PrefetchScalarGridSpec(
            num_scalar_prefetch=0,
            grid=grid,
            in_specs=in_specs,
            out_specs=out_spec,
        ),
        compiler_params=pltpu.CompilerParams(dimension_semantics=("parallel",)),
    )(*args)

    # y.unsqueeze(-2).repeat_interleave(in_dim, dim=-2): pure broadcast, done outside the
    # kernel so the kernel's HBM writeback is not in_dim-amplified.
    return jnp.broadcast_to(y[:, :, None, :], (B, N, in_dim, out_dim))


# ----------------------------------------------------------------------------- reference


def reference_forward(t, x, weights, biases, *, pooling, in_dim):
    """Pure-JAX reference matching the PyTorch semantics (mask=None)."""
    B, N, _ = x.shape
    h = jnp.concatenate([jnp.full((B, N, 1), t, x.dtype), x], axis=-1)
    for i, (w, b) in enumerate(zip(weights, biases)):
        h = h @ w + b
        if i < len(weights) - 1:
            h = jnp.tanh(h)
    mask = jnp.ones((B, N, 1), x.dtype)
    z = h * mask
    if pooling == "sum":
        y = z.sum(-2, keepdims=True) - z
    elif pooling == "mean":
        emb = z.sum(-2, keepdims=True) - z
        Ncount = mask.sum(-2, keepdims=True)
        denom = jnp.maximum(Ncount - 1.0, 1.0)[0]
        y = emb / denom
    elif pooling == "max":
        if N == 1:
            y = jnp.zeros_like(z)
        else:
            srt = jnp.sort(z, axis=-2)[..., ::-1, :]
            first, second = srt[..., 0:1, :], srt[..., 1:2, :]
            ind = (z == first).astype(z.dtype)
            y = (1.0 - ind) * first + ind * second
    else:
        raise ValueError(pooling)
    return jnp.repeat(y[..., None, :], in_dim, axis=-2)


# ----------------------------------------------------------------------------- demo / test

if __name__ == "__main__":
    # Module config: ZeroTraceEquivariantEncoder(in_dim=4, hidden_dims=[32, 32], out_dim=8)
    in_dim, hidden_dims, out_dim = 4, [32, 32], 8
    B, N = 2, 8
    t = 0.5

    key = jax.random.PRNGKey(0)
    dims = [in_dim + 1] + list(hidden_dims) + [out_dim]
    weights, biases = [], []
    for i in range(len(dims) - 1):
        key, kw, kb = jax.random.split(key, 3)
        weights.append(0.1 * jax.random.normal(kw, (dims[i], dims[i + 1]), jnp.float32))
        biases.append(0.1 * jax.random.normal(kb, (dims[i + 1],), jnp.float32))

    key, kx = jax.random.split(key)
    x = jax.random.normal(kx, (B, N, in_dim), jnp.float32)

    ok = True
    for pooling in ("mean", "sum", "max"):
        out = zero_trace_equivariant_encoder(
            t, x, weights, biases, pooling=pooling, in_dim=in_dim, out_dim=out_dim
        )
        out = jax.block_until_ready(out)
        ref = reference_forward(t, x, weights, biases, pooling=pooling, in_dim=in_dim)
        assert out.shape == (B, N, in_dim, out_dim), (pooling, out.shape)
        err = float(jnp.max(jnp.abs(out - ref)))
        if not jnp.allclose(out, ref, atol=1e-5, rtol=1e-5):
            ok = False
            print(f"MISMATCH pooling={pooling} max_abs_err={err}")

    if ok:
        print("KERNEL_OK")
</pallas_src>

<mosaic_0001>
module attributes {stable_mosaic.version = 11 : i64} {
  func.func @_kernel_body(%arg0: i32, %arg1: memref<1x8x4xf32, #tpu.memory_space<vmem>>, %arg2: memref<4x32xf32, #tpu.memory_space<vmem>>, %arg3: memref<1x32xf32, #tpu.memory_space<vmem>>, %arg4: memref<32x32xf32, #tpu.memory_space<vmem>>, %arg5: memref<1x32xf32, #tpu.memory_space<vmem>>, %arg6: memref<32x8xf32, #tpu.memory_space<vmem>>, %arg7: memref<1x8xf32, #tpu.memory_space<vmem>>, %arg8: memref<1x8x8xf32, #tpu.memory_space<vmem>>) attributes {dimension_semantics = [#tpu.dimension_semantics<parallel>], iteration_bounds = array<i64: 2>, scalar_prefetch = 0 : i64, scratch_operands = 0 : i64, tpu.core_type = #tpu.core_type<tc>, window_params = [{transform_indices = @transform_0, window_bounds = array<i64: 1, 8, 4>}, {pipeline_mode = #tpu.pipeline_mode<synchronous>, transform_indices = @transform_1, window_bounds = array<i64: 4, 32>}, {pipeline_mode = #tpu.pipeline_mode<synchronous>, transform_indices = @transform_2, window_bounds = array<i64: 1, 32>}, {pipeline_mode = #tpu.pipeline_mode<synchronous>, transform_indices = @transform_3, window_bounds = array<i64: 32, 32>}, {pipeline_mode = #tpu.pipeline_mode<synchronous>, transform_indices = @transform_4, window_bounds = array<i64: 1, 32>}, {pipeline_mode = #tpu.pipeline_mode<synchronous>, transform_indices = @transform_5, window_bounds = array<i64: 32, 8>}, {pipeline_mode = #tpu.pipeline_mode<synchronous>, transform_indices = @transform_6, window_bounds = array<i64: 1, 8>}, {transform_indices = @transform_7, window_bounds = array<i64: 1, 8, 8>}]} {
    %c0 = arith.constant 0 : index
    %c0_0 = arith.constant 0 : index
    %c0_1 = arith.constant 0 : index
    %0 = vector.load %arg1[%c0, %c0_0, %c0_1] : memref<1x8x4xf32, #tpu.memory_space<vmem>>, vector<1x8x4xf32>
    %1 = vector.shape_cast %0 : vector<1x8x4xf32> to vector<8x4xf32>
    %c0_2 = arith.constant 0 : index
    %c0_3 = arith.constant 0 : index
    %2 = vector.load %arg2[%c0_2, %c0_3] : memref<4x32xf32, #tpu.memory_space<vmem>>, vector<4x32xf32>
    %c0_4 = arith.constant 0 : index
    %c0_5 = arith.constant 0 : index
    %3 = vector.load %arg3[%c0_4, %c0_5] : memref<1x32xf32, #tpu.memory_space<vmem>>, vector<1x32xf32>
    %cst = arith.constant dense<0.000000e+00> : vector<8x32xf32>
    %4 = tpu.matmul %1, %2, %cst {dimension_numbers = #tpu.dot_dimension_numbers<[1], [0], [0], [1], [0, 0, 1, 1], [], []>} : vector<8x4xf32>, vector<4x32xf32>, vector<8x32xf32> -> vector<8x32xf32>
    %5 = vector.broadcast %3 : vector<1x32xf32> to vector<8x32xf32>
    %6 = arith.addf %4, %5 : vector<8x32xf32>
    %7 = math.tanh %6 : vector<8x32xf32>
    %c0_6 = arith.constant 0 : index
    %c0_7 = arith.constant 0 : index
    %8 = vector.load %arg4[%c0_6, %c0_7] : memref<32x32xf32, #tpu.memory_space<vmem>>, vector<32x32xf32>
    %c0_8 = arith.constant 0 : index
    %c0_9 = arith.constant 0 : index
    %9 = vector.load %arg5[%c0_8, %c0_9] : memref<1x32xf32, #tpu.memory_space<vmem>>, vector<1x32xf32>
    %cst_10 = arith.constant dense<0.000000e+00> : vector<8x32xf32>
    %10 = tpu.matmul %7, %8, %cst_10 {dimension_numbers = #tpu.dot_dimension_numbers<[1], [0], [0], [1], [0, 0, 1, 1], [], []>} : vector<8x32xf32>, vector<32x32xf32>, vector<8x32xf32> -> vector<8x32xf32>
    %11 = vector.broadcast %9 : vector<1x32xf32> to vector<8x32xf32>
    %12 = arith.addf %10, %11 : vector<8x32xf32>
    %13 = math.tanh %12 : vector<8x32xf32>
    %c0_11 = arith.constant 0 : index
    %c0_12 = arith.constant 0 : index
    %14 = vector.load %arg6[%c0_11, %c0_12] : memref<32x8xf32, #tpu.memory_space<vmem>>, vector<32x8xf32>
    %c0_13 = arith.constant 0 : index
    %c0_14 = arith.constant 0 : index
    %15 = vector.load %arg7[%c0_13, %c0_14] : memref<1x8xf32, #tpu.memory_space<vmem>>, vector<1x8xf32>
    %cst_15 = arith.constant dense<0.000000e+00> : vector<8x8xf32>
    %16 = tpu.matmul %13, %14, %cst_15 {dimension_numbers = #tpu.dot_dimension_numbers<[1], [0], [0], [1], [0, 0, 1, 1], [], []>} : vector<8x32xf32>, vector<32x8xf32>, vector<8x8xf32> -> vector<8x8xf32>
    %17 = vector.broadcast %15 : vector<1x8xf32> to vector<8x8xf32>
    %18 = arith.addf %16, %17 : vector<8x8xf32>
    %19 = vector.shape_cast %18 : vector<8x8xf32> to vector<1x8x8xf32>
    %cst_16 = arith.constant dense<0.000000e+00> : vector<1x8xf32>
    %20 = vector.multi_reduction <add>, %19, %cst_16 [1] : vector<1x8x8xf32> to vector<1x8xf32>
    %21 = vector.shape_cast %20 : vector<1x8xf32> to vector<1x1x8xf32>
    %22 = vector.broadcast %21 : vector<1x1x8xf32> to vector<1x8x8xf32>
    %23 = arith.subf %22, %19 : vector<1x8x8xf32>
    %cst_17 = arith.constant 0.142857149 : f32
    %24 = vector.broadcast %cst_17 : f32 to vector<1x8x8xf32>
    %25 = arith.mulf %23, %24 : vector<1x8x8xf32>
    %c0_18 = arith.constant 0 : index
    %c0_19 = arith.constant 0 : index
    %c0_20 = arith.constant 0 : index
    %26 = vector.load %arg8[%c0_18, %c0_19, %c0_20] : memref<1x8x8xf32, #tpu.memory_space<vmem>>, vector<1x8x8xf32>
    tpu.vector_store %arg8[%c0_18, %c0_19, %c0_20], %25 {strides = array<i32>} : memref<1x8x8xf32, #tpu.memory_space<vmem>>, vector<1x8x8xf32>,
    return
  }
  func.func @transform_0(%arg0: i32) -> (i32, i32, i32) {
    %c0_i32 = arith.constant 0 : i32
    %c0_i32_0 = arith.constant 0 : i32
    %c0_i32_1 = arith.constant 0 : i32
    return %arg0, %c0_i32, %c0_i32_0 : i32, i32, i32
  }
  func.func @transform_1(%arg0: i32) -> (i32, i32) {
    %c0_i32 = arith.constant 0 : i32
    %c0_i32_0 = arith.constant 0 : i32
    %c0_i32_1 = arith.constant 0 : i32
    return %c0_i32, %c0_i32_0 : i32, i32
  }
  func.func @transform_2(%arg0: i32) -> (i32, i32) {
    %c0_i32 = arith.constant 0 : i32
    %c0_i32_0 = arith.constant 0 : i32
    %c0_i32_1 = arith.constant 0 : i32
    return %c0_i32, %c0_i32_0 : i32, i32
  }
  func.func @transform_3(%arg0: i32) -> (i32, i32) {
    %c0_i32 = arith.constant 0 : i32
    %c0_i32_0 = arith.constant 0 : i32
    %c0_i32_1 = arith.constant 0 : i32
    return %c0_i32, %c0_i32_0 : i32, i32
  }
  func.func @transform_4(%arg0: i32) -> (i32, i32) {
    %c0_i32 = arith.constant 0 : i32
    %c0_i32_0 = arith.constant 0 : i32
    %c0_i32_1 = arith.constant 0 : i32
    return %c0_i32, %c0_i32_0 : i32, i32
  }
  func.func @transform_5(%arg0: i32) -> (i32, i32) {
    %c0_i32 = arith.constant 0 : i32
    %c0_i32_0 = arith.constant 0 : i32
    %c0_i32_1 = arith.constant 0 : i32
    return %c0_i32, %c0_i32_0 : i32, i32
  }
  func.func @transform_6(%arg0: i32) -> (i32, i32) {
    %c0_i32 = arith.constant 0 : i32
    %c0_i32_0 = arith.constant 0 : i32
    %c0_i32_1 = arith.constant 0 : i32
    return %c0_i32, %c0_i32_0 : i32, i32
  }
  func.func @transform_7(%arg0: i32) -> (i32, i32, i32) {
    %c0_i32 = arith.constant 0 : i32
    %c0_i32_0 = arith.constant 0 : i32
    %c0_i32_1 = arith.constant 0 : i32
    return %arg0, %c0_i32, %c0_i32_0 : i32, i32, i32
  }
}

</mosaic_0001>

<bundles_post_ra>
// kernel: tpu_custom_call.1
= control target key start
LH: loop header
LB: loop body
LE: loop exit
PB: predicated region body
PF: predicated region fallthrough
CT: control target
= control target key end

     0   :  { %12 = vsyncpa [#allocation3], 0  ;;  %s949_s0 = inlined_call_operand.vmem [shape: f32[2,8,4], index: 0, kind: input, shape index: {}]   ;;  %s950_s1 = inlined_call_operand.vmem [shape: f32[4,32], index: 1, kind: input, shape index: {}]   ;;  %s951_s2 = inlined_call_operand.vmem [shape: f32[1,32], index: 2, kind: input, shape index: {}]   ;;  %s952_s3 = inlined_call_operand.vmem [shape: f32[32,32], index: 3, kind: input, shape index: {}]   ;;  %s953_s4 = inlined_call_operand.vmem [shape: f32[1,32], index: 4, kind: input, shape index: {}]   ;;  %s954_s5 = inlined_call_operand.vmem [shape: f32[32,8], index: 5, kind: input, shape index: {}]   ;;  %s955_s6 = inlined_call_operand.vmem [shape: f32[1,8], index: 6, kind: input, shape index: {}]   ;;  %s956_s7 = inlined_call_operand.hbm [shape: f32[2,8,8], index: 7, kind: output, shape index: {}]  }
   0x1   :  { %14 = vsyncpa [#allocation3 + $0x1], 0  ;;  %s822_s24 = smov 0   ;;  %s824_s25 = smov 0  }
   0x2   :  { %s826_s26 = smov 0   ;;  %s828_s27 = smov 0  }
   0x3 LB: > { %s843_s28 = sadd.s32 4294967295, %s777_s27   ;;  %s616_s29 = sadd.s32 4294967294, %s777_s27   ;;  %s777_s27 = sphi %s828_s27, %s962_s27   ;;  %s773_s26 = sphi %s826_s26, %s961_s26   ;;  %s769_s25 = sphi %s824_s25, %s960_s25   ;;  %s765_s24 = sphi %s822_s24, %s959_s24  }
   0x4   : > { %s847_s30 = sadd.s32 1, %s777_s27   ;;  %s179_s8 = sadd.s32 1, %s773_s26 }
   0x5   : > { %s176_s9 = ssub.s32 %s777_s27, %s847_s30  ;;  %p189_p0 = scmp.ne.s32.totalorder %s773_s26, %s769_s25 }
   0x6   : > { %p177_p1 = scmp.eq.s32.totalorder %s176_s9, 0  ;;  %p190_p2 = scmp.eq.s32.totalorder %s843_s28, 1 }
   0x7   : > { %p195_p3 = scmp.ne.s32.totalorder %s769_s25, %s765_s24  ;;  %p196_p4 = scmp.eq.s32.totalorder %s616_s29, 1 }
   0x8   : > { %s858_s10 = scalar_select %p177_p1, %s773_s26, %s179_s8  }
   0x9   : > { %p860_p5 = por %p190_p2, %p189_p0  ;;  %p864_p6 = por %p196_p4, %p195_p3 }
   0xa   : > { %p619_p7 = scmp.ge.s32.totalorder %s777_s27, 1  ;;  %p239_p8 = scmp.lt.s32.totalorder %s777_s27, 3 }
   0xc   : > { %p240_p9 = pnand %p619_p7, %p239_p8 }
   0xd   : > { %p270_p10 = scmp.lt.s32.totalorder (!%p240_p9), %s843_s28, 1  ;;  %s267_s14 = sand.u32 (!%p240_p9), 1, %s769_s25  }
   0xe   : > { %243 = sbr.rel (%p240_p9) target bundleno = 667 (0x29b), region = 48  ;;  %s544_s22 = scalar_lea.sflag (!%p240_p9), [#allocation3], %s267_s14 }
   0xf   : > { %s781_s29 = smov (!%p240_p9), [#allocation2]  }
  0x10   : > { %s721_s8 = sshll.u32 (!%p240_p9), %s781_s29, 4  ;;  %s722_s8 = int_to_ptr.vmem [resolvable:$false] %s721_s8 }
  0x13   : > { %v275_v0 = vld [vmem:[%s950_s1] sm:$0xf]  ;;  %vm287_vm0 = vcmask 1043456   ;;  %v779_v1 = vmov 0.0   ;;  %vm780_vm1 = vmmov 0   ;;  %s271_s15 = scalar_select %p270_p10, %s843_s28, 1 }
  0x14   : > { %645 = vmatprep.subr.mxu0 %v779_v1  ;;  %647 = vmatprep.mubr.msk.f32.mxu0 %vm780_vm1, %v779_v1  ;;  %vm283_vm2 = vcmask 31744   ;;  %v365_v3 = vld [vmem:[%s952_s3 + $0x18] sm:$0xff]  ;;  %v364_v4 = vld [vmem:[%s952_s3 + $0x10] sm:$0xff]  ;;  %v363_v5 = vld [vmem:[%s952_s3 + $0x8] sm:$0xff]  ;;  %vm373_vm3 = vcmask 261120   ;;  %vm532_vm4 = vcmask 64512  }
  0x15   : > { %646 = vmatpush3.msk.msra.mxu0 %vm287_vm0, %v275_v0  ;;  %650 = vmatprep.subr.mxu1 %v779_v1  ;;  %s621_s16 = sshll.u32 %s271_s15, 3  ;;  %v362_v6 = vld [vmem:[%s952_s3] sm:$0xff]  ;;  %v451_v12 = vld [vmem:[%s954_s5 + $0x18] sm:$0xff]  ;;  %v450_v13 = vld [vmem:[%s954_s5 + $0x10] sm:$0xff]  ;;  %s620_s15 = sshll.u32 %s267_s14, 3 }
  0x16   : > { %658 = vmatprep.mubr.msk.f32.mxu1 %vm780_vm1, %v779_v1  ;;  %661 = vmatprep.subr.mxu0 %v779_v1  ;;  %s273_s19 = scalar_lea.vmem %s949_s0, %s621_s16  ;;  %v622_v7 = vld [vmem:[%s951_s2] ss:$0 sm:$0xff]  ;;  %v449_v14 = vld [vmem:[%s954_s5 + $0x8] sm:$0xff]  ;;  %s630_s16 = sshll.u32 %s843_s28, 7 }
  0x17   : > { %v274_v2 = vld [vmem:[%s273_s19] sm:$0xff]  ;;  %651 = vmatpush3.msra.mxu1 %v365_v3  ;;  %s269_s17 = scalar_lea.vmem [#allocation2], %s620_s15  ;;  %s555_s21 = scalar_lea.hbm %s956_s7, %s630_s16 }
  0x18   : > { %648 = vmatmul.mubr.msk.f32.vlgmr.msra.gmra.mxu0 %vm283_vm2, %v274_v2  ;;  %652 = vmatprep.subr.mxu1 %v779_v1  ;;  %v448_v15 = vld [vmem:[%s954_s5] sm:$0xff]  ;;  %s557_s18 = sshll.u32 %s269_s17, 4  ;;  %s723_s28 = scalar_lea.vmem %s722_s8, 256  ;;  %s558_s18 = int_to_ptr.vmem [resolvable:$true] %s557_s18 }
  0x19   : > { %669 = vmatprep.mubr.msk.f32.mxu0 %vm780_vm1, %v779_v1  ;;  %653 = vmatpush3.msra.mxu1 %v364_v4  ;;  %v625_v16 = vld [vmem:[%s953_s4] ss:$0 sm:$0xff]  ;;  %s717_s23 = scalar_lea.vmem %s558_s18, 128  ;;  %p724_p0 = scmp.lt.s32.totalorder %s558_s18, %s722_s8 }
  0x1a   : > { %654 = vmatprep.subr.mxu1 %v779_v1  ;;  %662 = vmatpush3.msra.mxu0 %v451_v12  ;;  %v627_v21 = vld [vmem:[%s955_s6] ss:$0 sm:$0xff]  ;;  %p718_p11 = scmp.ne.s32.totalorder %s558_s18, %s717_s23  ;;  %p725_p1 = scmp.lt.s32.totalorder %s723_s28, %s717_s23 }
  0x1b   : > { %655 = vmatpush3.msra.mxu1 %v363_v5  ;;  %663 = vmatprep.subr.mxu0 %v779_v1 }
  0x1c   : > { %656 = vmatprep.subr.mxu1 %v779_v1  ;;  %664 = vmatpush3.msra.mxu0 %v450_v13  ;;  %p719_p12 = pnand %p718_p11, %p860_p5  ;;  %p726_p2 = por %p725_p1, %p724_p0 }
  0x1d   : > { %657 = vmatpush3.msra.mxu1 %v362_v6  ;;  %665 = vmatprep.subr.mxu0 %v779_v1 }
  0x1e   : > { %666 = vmatpush3.msra.mxu0 %v449_v14  ;;  %p720_p13 = pneg %p719_p12 }
  0x1f   : > { %667 = vmatprep.subr.mxu0 %v779_v1 }
  0x20   : > { %668 = vmatpush3.msra.mxu0 %v448_v15  ;;  %p727_p3 = pnand %p726_p2, %p720_p13 }
  0xd8   : > { %v357_v8 = vpop.f32.mrf.mxu0 }
  0xd9   : > { %v358_v9 = vadd.f32 %v622_v7, %v357_v8 }
  0xda   : > { %v649_v10 = vpop.f32.mrf.mxu0 }
  0xdb   : > { %713 = vtanh.f32 %v358_v9 }
  0xe8   : > { %v714_v11 = vpop.eup %713 }
  0xe9   : > { %659 = vmatmul.mubr.msk.f32.vlgmr.msra.gmra.mxu1 %vm373_vm3, %v714_v11 }
 0x1a9   : > { %v443_v17 = vpop.f32.mrf.mxu1 }
 0x1aa   : > { %v444_v18 = vadd.f32 %v625_v16, %v443_v17 }
 0x1ab   : > { %v660_v19 = vpop.f32.mrf.mxu1 }
 0x1ac   : > { %715 = vtanh.f32 %v444_v18 }
 0x1b9   : > { %v716_v20 = vpop.eup %715 }
 0x1ba   : > { %670 = vmatmul.mubr.msk.f32.vlgmr.msra.gmra.mxu0 %vm373_vm3, %v716_v20 }
 0x27a   : > { %v528_v22 = vpop.f32.mrf.mxu0 }
 0x27b   : > { %v529_v23 = vadd.f32 %v627_v21, %v528_v22 }
 0x27c   : > { %v671_v24 = vpop.f32.mrf.mxu0 }
 0x27d   : > { %v533_v25 = vsel %vm532_vm4, %v529_v23, 0.0 }
 0x27e   : > { %v534_v26 = vrot.slane %v533_v25, 4 }
 0x280   : > { %v535_v27 = vadd.f32 %v534_v26, %v533_v25 }
 0x282   : > { %v536_v28 = vrot.slane %v535_v27, 2 }
 0x284   : > { %v537_v29 = vadd.f32 %v536_v28, %v535_v27 }
 0x286   : > { %v538_v30 = vrot.slane %v537_v29, 1 }
 0x288   : > { %v539_v31 = vadd.f32 %v538_v30, %v537_v29 }
 0x28a   : > { %v540_v32 = vsub.f32 %v539_v31, %v529_v23 }
 0x28c   : > { %v541_v33 = vmul.f32 0.14285715, %v540_v32 }
 0x28e   : > { %542 = vst.msk [vmem:[%s269_s17] sm:$0xff] %vm532_vm4, %v541_v33 }
 0x28f   : > { %730 = shalt.err (!%p727_p3)
}
 0x290   : > { %s731_s9 = scalar_lea.hbm %s555_s21, 128  ;;  %s735_s15 = scalar_lea.hbm %s956_s7, 256 }
 0x291   : > { %p732_p4 = scmp.ne.s32.totalorder %s555_s21, %s731_s9  ;;  %p736_p9 = scmp.lt.s32.totalorder %s555_s21, %s956_s7 }
 0x292   : > { %p737_p10 = scmp.lt.s32.totalorder %s735_s15, %s731_s9 }
 0x293   : > { %p733_p7 = pnand %p732_p4, %p860_p5 }
 0x294   : > { %p738_p11 = por %p737_p10, %p736_p9 }
 0x295   : > { %p734_p8 = pneg %p733_p7 }
 0x297   : > { %p739_p12 = pnand %p738_p11, %p734_p8 }
 0x299   : > { %742 = shalt.err (!%p739_p12)
}
 0x29a   : > { %672 = dma.vmem_to_hbm [thread:$0]  (%p860_p5), %s558_s18, 128, %s555_s21, %s544_s22  }
 0x29b PF: > { %p678_p13 = scmp.ge.s32.totalorder %s777_s27, 2  ;;  %s569_s19 = sand.u32 1, %s765_s24  }
 0x29c   : > { %s570_s20 = scalar_lea.sflag [#allocation3], %s569_s19 }
 0x29d   : > { %p675_p0 = pnand %p678_p13, %p864_p6 }
 0x29f   : > { %p676_p1 = pneg %p675_p0 }
 0x2a1   : > { %760 = dma.done.wait (%p676_p1), %s570_s20, 128  }
 0x2a2   : > { %762 = vsyncadd (%p676_p1), %s570_s20, 4294967168  ;;  %p17_p2 = scmp.ge.s32.totalorder %s847_s30, 4   ;;  %s959_s24 = smov %s769_s25 }
 0x2a3   : > { %s960_s25 = smov %s773_s26  ;;  %s961_s26 = smov %s858_s10 }
 0x2a4   : > { %s962_s27 = smov %s847_s30  ;;  %19 = sbr.rel (!%p17_p2) target bundleno = 3 (0x3), region = 83 }
 0x2a9   :  { %575 = vsyncpa [#allocation3], 1 }
 0x2aa   :  { %577 = vsyncpa [#allocation3 + $0x1], 1 }

</bundles_post_ra>
